<compile_context>
chip_gen: v7x
topology: tpu7x:2x2x1
jax: 0.10.0
libtpu: 0.0.40
codegen_flags: <defaults>
</compile_context>

<pallas_src>
import functools

import jax
import jax.numpy as jnp
from jax.experimental import pallas as pl
from jax.experimental.pallas import tpu as pltpu


def _round_up(n, m):
    return ((n + m - 1) // m) * m


# ---------------------------------------------------------------------------
# Kernels
# ---------------------------------------------------------------------------

def _self_attn_kernel_plain(x_ref, w_ref, b_ref, out_ref, att_ref, *, matmul_dtype):
    """Row tile (tm, C): proj -> tanh -> softmax(dim=-1) -> exp -> gate."""
    x = x_ref[...]                                            # (tm, C) f32
    xm = x.astype(matmul_dtype) if matmul_dtype is not None else x
    # 1x1 conv == dense: (tm, C) @ (C, C) on the MXU, f32 accumulate; bias in f32.
    y = jnp.dot(xm, w_ref[...], preferred_element_type=jnp.float32) + b_ref[...]
    # tanh(y) is in [-1, 1] so exp() cannot overflow: no max-subtraction needed.
    e = jnp.exp(jnp.tanh(y))
    s = jnp.sum(e, axis=-1, keepdims=True)
    att = jnp.exp(e / s)                                      # exact divide
    att_ref[...] = att.astype(att_ref.dtype)
    out_ref[...] = (x * att).astype(out_ref.dtype)


def _self_attn_kernel_packed(x_ref, w_ref, b_ref, seg_ref, out_ref, att_ref, *,
                             matmul_dtype):
    """Lane-dense tile for C < 128: each slab row holds r = 128//C batch samples.

    w_ref is the (r*C, r*C) block-diagonal weight; seg_ref is the (r*C, r*C)
    block-diagonal ones matrix giving per-sample softmax sums via the idle MXU.
    """
    x = x_ref[...]                                            # (tms, r*C) f32
    xm = x.astype(matmul_dtype) if matmul_dtype is not None else x
    y = jnp.dot(xm, w_ref[...], preferred_element_type=jnp.float32) + b_ref[...]
    e = jnp.exp(jnp.tanh(y))                                  # [-1,1] -> safe w/o max-sub
    # Per-sample softmax denominator, broadcast across that sample's C lanes.
    s = jnp.dot(e, seg_ref[...], preferred_element_type=jnp.float32)
    att = jnp.exp(e / s)
    att_ref[...] = att.astype(att_ref.dtype)
    out_ref[...] = (x * att).astype(out_ref.dtype)


# ---------------------------------------------------------------------------
# Wrapper
# ---------------------------------------------------------------------------

def _device_plan():
    """(row-tile target, usable VMEM budget in bytes) per TPU generation."""
    try:
        kind = jax.devices()[0].device_kind.lower()
    except Exception:
        kind = ""
    if "v7" in kind:
        return 512, 44 << 20                  # v7x: 64 MiB physical VMEM -> headroom
    if any(("v%d" % v) in kind for v in (2, 3, 4, 5, 6)):
        return 2048, 96 << 20                 # v5e/v6e: 128 MiB physical VMEM
    return 512, 44 << 20                      # unknown backend: conservative


def self_attn_forward(x, w, b, *, block_rows=None, matmul_dtype=jnp.bfloat16,
                      att_dtype=None):
    """x: (B, C) f32; w: (C_in, C_out); b: (C_out,).  Returns (out, attention)."""
    B, C = x.shape
    assert w.shape == (C, C) and b.shape == (C,)
    att_dtype = x.dtype if att_dtype is None else att_dtype
    w_dtype = matmul_dtype if matmul_dtype is not None else w.dtype

    # Lane packing: with C < 128 a (tm, C) tile uses only C/128 of each 128-lane vreg
    # and output stores become masked partial stores; pack r = 128//C rows per lane row.
    packed = (C < 128) and (128 % C == 0)
    r = (128 // C) if packed else 1
    cp = r * C                                 # lane width presented to the kernel
    unit = 8 * r                               # min batch rows per tile (8 sublanes)

    tile_target, vmem_budget = _device_plan()
    if block_rows is not None:
        tile_target = int(block_rows)

    # Row tile (in batch samples), multiple of `unit`, no bigger than the padded batch.
    tm = max(unit, (min(tile_target, _round_up(B, unit)) // unit) * unit)
    if B > unit:
        # >= 2 grid steps so both v7x TensorCores get work on the parallel batch axis.
        tm = min(tm, _round_up(-(-B // 2), unit))

    itemsize_w = jnp.dtype(w_dtype).itemsize
    itemsize_att = jnp.dtype(att_dtype).itemsize

    def vmem_need(tm_rows):
        tms_ = tm_rows // r
        resident = cp * cp * itemsize_w + cp * 4           # W + bias (single-buffered)
        if packed:
            resident += cp * cp * 4                        # segment-sum ones matrix
        streams = 2 * tms_ * cp * (4 + 4 + itemsize_att)   # double-buffered x/out/att
        return resident + streams

    while tm > unit and vmem_need(tm) > vmem_budget:
        tm = max(unit, (tm // 2 // unit) * unit)
    # TODO(synk): for very large C (>= ~4K) even tm == unit overflows v7x's 64 MiB VMEM;
    # add an N-tiled two-pass (or online) softmax fallback instead of a resident W.
    vmem_limit = int(min(max(vmem_need(tm) + (8 << 20), 32 << 20), 112 << 20))

    # --- operands: pad batch, lane-pack (free reshape), cast resident W once ------
    b_pad = _round_up(B, tm)
    x_in = jnp.pad(x, ((0, b_pad - B), (0, 0))) if b_pad != B else x
    x_in = x_in.reshape(b_pad // r, cp)

    if packed:
        w_full = jnp.kron(jnp.eye(r, dtype=w.dtype), w)            # block-diag (cp, cp)
        b_full = jnp.tile(b, r).reshape(1, cp).astype(jnp.float32)
        seg = jnp.kron(jnp.eye(r, dtype=jnp.float32),
                       jnp.ones((C, C), jnp.float32))              # per-sample lane sums
    else:
        w_full = w
        b_full = b.reshape(1, cp).astype(jnp.float32)
        seg = None
    w_in = w_full.astype(w_dtype)                                  # cast once, wrapper-side

    tms = tm // r
    grid = (b_pad // tm,)
    out_shapes = (jax.ShapeDtypeStruct((b_pad // r, cp), x.dtype),
                  jax.ShapeDtypeStruct((b_pad // r, cp), att_dtype))

    if packed:
        kernel = functools.partial(_self_attn_kernel_packed, matmul_dtype=matmul_dtype)
    else:
        kernel = functools.partial(_self_attn_kernel_plain, matmul_dtype=matmul_dtype)

    def make_call(single_buffer_consts):
        const_kw = ({"pipeline_mode": pl.Buffered(1)} if single_buffer_consts else {})
        in_specs = [
            pl.BlockSpec((tms, cp), lambda i: (i, 0)),              # streamed x tile
            pl.BlockSpec((cp, cp), lambda i: (0, 0), **const_kw),   # resident W
            pl.BlockSpec((1, cp), lambda i: (0, 0), **const_kw),    # resident bias
        ]
        if packed:
            in_specs.append(
                pl.BlockSpec((cp, cp), lambda i: (0, 0), **const_kw))  # seg-sum matrix
        return pl.pallas_call(
            kernel,
            grid=grid,
            out_shape=out_shapes,
            in_specs=in_specs,
            out_specs=(pl.BlockSpec((tms, cp), lambda i: (i, 0)),
                       pl.BlockSpec((tms, cp), lambda i: (i, 0))),
            compiler_params=pltpu.CompilerParams(
                dimension_semantics=("parallel",),
                vmem_limit_bytes=vmem_limit,
            ),
        )

    args = (x_in, w_in, b_full) + ((seg,) if packed else ())
    try:
        out, att = jax.block_until_ready(make_call(True)(*args))
    except Exception:
        # Compatibility fallback for jax builds without BlockSpec(pipeline_mode=...).
        out, att = jax.block_until_ready(make_call(False)(*args))

    out = out.reshape(b_pad, C)[:B]
    att = att.reshape(b_pad, C)[:B]
    return out, att


# ---------------------------------------------------------------------------
# Reference + self-test
# ---------------------------------------------------------------------------

def _reference(x, w, b, matmul_dtype=None):
    if matmul_dtype is not None:
        y = jnp.dot(x.astype(matmul_dtype), w.astype(matmul_dtype),
                    preferred_element_type=jnp.float32) + b[None, :]
    else:
        y = x @ w + b[None, :]
    soft = jax.nn.softmax(jnp.tanh(y), axis=-1)
    att = jnp.exp(soft)
    return x * att, att


if __name__ == "__main__":
    # Two small configs: C=32 exercises the lane-packed path (r=4, grid padding),
    # C=128 exercises the plain path with a 2-step batch grid.
    for (B, C) in ((20, 32), (12, 128)):
        key = jax.random.PRNGKey(0)
        kx, kw, kb = jax.random.split(key, 3)
        bound = 1.0 / jnp.sqrt(jnp.float32(C))
        # Equivalent to nn.Conv2d(C, C, 1): w = conv.weight[:, :, 0, 0].T -> (C_in, C_out)
        w = jax.random.uniform(kw, (C, C), jnp.float32, -bound, bound)
        b = jax.random.uniform(kb, (C,), jnp.float32, -bound, bound)
        x = jax.random.normal(kx, (B, C), jnp.float32)

        # Default fast path: bf16 MXU inputs, f32 accumulate / transcendentals.
        out, att = jax.block_until_ready(self_attn_forward(x, w, b))
        ref_out, ref_att = _reference(x, w, b, matmul_dtype=jnp.bfloat16)
        assert out.shape == (B, C) and att.shape == (B, C)
        assert jnp.allclose(out, ref_out, atol=5e-4, rtol=5e-4)
        assert jnp.allclose(att, ref_att, atol=5e-4, rtol=5e-4)

        # Exact-f32 path matches the PyTorch-equivalent reference tightly.
        out32, att32 = jax.block_until_ready(
            self_attn_forward(x, w, b, matmul_dtype=None))
        r_out, r_att = _reference(x, w, b)
        assert jnp.allclose(out32, r_out, atol=1e-4, rtol=1e-4)
        assert jnp.allclose(att32, r_att, atol=1e-4, rtol=1e-4)

    print("KERNEL_OK")
</pallas_src>

<mosaic_0001>
module attributes {stable_mosaic.version = 11 : i64} {
  func.func @_self_attn_kernel_packed(%arg0: i32, %arg1: memref<8x128xf32, #tpu.memory_space<vmem>>, %arg2: memref<128x128xbf16, #tpu.memory_space<vmem>>, %arg3: memref<1x128xf32, #tpu.memory_space<vmem>>, %arg4: memref<128x128xf32, #tpu.memory_space<vmem>>, %arg5: memref<8x128xf32, #tpu.memory_space<vmem>>, %arg6: memref<8x128xf32, #tpu.memory_space<vmem>>) attributes {dimension_semantics = [#tpu.dimension_semantics<parallel>], iteration_bounds = array<i64: 1>, scalar_prefetch = 0 : i64, scratch_operands = 0 : i64, tpu.core_type = #tpu.core_type<tc>, window_params = [{transform_indices = @transform_0, window_bounds = array<i64: 8, 128>}, {pipeline_mode = #tpu.pipeline_mode<synchronous>, transform_indices = @transform_1, window_bounds = array<i64: 128, 128>}, {pipeline_mode = #tpu.pipeline_mode<synchronous>, transform_indices = @transform_2, window_bounds = array<i64: 1, 128>}, {pipeline_mode = #tpu.pipeline_mode<synchronous>, transform_indices = @transform_3, window_bounds = array<i64: 128, 128>}, {transform_indices = @transform_4, window_bounds = array<i64: 8, 128>}, {transform_indices = @transform_5, window_bounds = array<i64: 8, 128>}]} {
    %c0 = arith.constant 0 : index
    %c0_0 = arith.constant 0 : index
    %0 = vector.load %arg1[%c0, %c0_0] : memref<8x128xf32, #tpu.memory_space<vmem>>, vector<8x128xf32>
    %1 = arith.truncf %0 : vector<8x128xf32> to vector<8x128xbf16>
    %c0_1 = arith.constant 0 : index
    %c0_2 = arith.constant 0 : index
    %2 = vector.load %arg2[%c0_1, %c0_2] : memref<128x128xbf16, #tpu.memory_space<vmem>>, vector<128x128xbf16>
    %cst = arith.constant dense<0.000000e+00> : vector<8x128xf32>
    %3 = tpu.matmul %1, %2, %cst {dimension_numbers = #tpu.dot_dimension_numbers<[1], [0], [0], [1], [0, 0, 1, 1], [], []>} : vector<8x128xbf16>, vector<128x128xbf16>, vector<8x128xf32> -> vector<8x128xf32>
    %c0_3 = arith.constant 0 : index
    %c0_4 = arith.constant 0 : index
    %4 = vector.load %arg3[%c0_3, %c0_4] : memref<1x128xf32, #tpu.memory_space<vmem>>, vector<1x128xf32>
    %5 = vector.broadcast %4 : vector<1x128xf32> to vector<8x128xf32>
    %6 = arith.addf %3, %5 : vector<8x128xf32>
    %7 = math.tanh %6 : vector<8x128xf32>
    %8 = math.exp %7 : vector<8x128xf32>
    %c0_5 = arith.constant 0 : index
    %c0_6 = arith.constant 0 : index
    %9 = vector.load %arg4[%c0_5, %c0_6] : memref<128x128xf32, #tpu.memory_space<vmem>>, vector<128x128xf32>
    %cst_7 = arith.constant dense<0.000000e+00> : vector<8x128xf32>
    %10 = tpu.matmul %8, %9, %cst_7 {dimension_numbers = #tpu.dot_dimension_numbers<[1], [0], [0], [1], [0, 0, 1, 1], [], []>} : vector<8x128xf32>, vector<128x128xf32>, vector<8x128xf32> -> vector<8x128xf32>
    %11 = arith.divf %8, %10 : vector<8x128xf32>
    %12 = math.exp %11 : vector<8x128xf32>
    %c0_8 = arith.constant 0 : index
    %c0_9 = arith.constant 0 : index
    %13 = vector.load %arg6[%c0_8, %c0_9] : memref<8x128xf32, #tpu.memory_space<vmem>>, vector<8x128xf32>
    tpu.vector_store %arg6[%c0_8, %c0_9], %12 {strides = array<i32>} : memref<8x128xf32, #tpu.memory_space<vmem>>, vector<8x128xf32>,
    %14 = arith.mulf %0, %12 : vector<8x128xf32>
    %c0_10 = arith.constant 0 : index
    %c0_11 = arith.constant 0 : index
    %15 = vector.load %arg5[%c0_10, %c0_11] : memref<8x128xf32, #tpu.memory_space<vmem>>, vector<8x128xf32>
    tpu.vector_store %arg5[%c0_10, %c0_11], %14 {strides = array<i32>} : memref<8x128xf32, #tpu.memory_space<vmem>>, vector<8x128xf32>,
    return
  }
  func.func @transform_0(%arg0: i32) -> (i32, i32) {
    %c0_i32 = arith.constant 0 : i32
    %c0_i32_0 = arith.constant 0 : i32
    return %arg0, %c0_i32 : i32, i32
  }
  func.func @transform_1(%arg0: i32) -> (i32, i32) {
    %c0_i32 = arith.constant 0 : i32
    %c0_i32_0 = arith.constant 0 : i32
    %c0_i32_1 = arith.constant 0 : i32
    return %c0_i32, %c0_i32_0 : i32, i32
  }
  func.func @transform_2(%arg0: i32) -> (i32, i32) {
    %c0_i32 = arith.constant 0 : i32
    %c0_i32_0 = arith.constant 0 : i32
    %c0_i32_1 = arith.constant 0 : i32
    return %c0_i32, %c0_i32_0 : i32, i32
  }
  func.func @transform_3(%arg0: i32) -> (i32, i32) {
    %c0_i32 = arith.constant 0 : i32
    %c0_i32_0 = arith.constant 0 : i32
    %c0_i32_1 = arith.constant 0 : i32
    return %c0_i32, %c0_i32_0 : i32, i32
  }
  func.func @transform_4(%arg0: i32) -> (i32, i32) {
    %c0_i32 = arith.constant 0 : i32
    %c0_i32_0 = arith.constant 0 : i32
    return %arg0, %c0_i32 : i32, i32
  }
  func.func @transform_5(%arg0: i32) -> (i32, i32) {
    %c0_i32 = arith.constant 0 : i32
    %c0_i32_0 = arith.constant 0 : i32
    return %arg0, %c0_i32 : i32, i32
  }
}

module attributes {stable_mosaic.version = 11 : i64} {
  func.func @_self_attn_kernel_packed(%arg0: i32, %arg1: memref<8x128xf32, #tpu.memory_space<vmem>>, %arg2: memref<128x128xbf16, #tpu.memory_space<vmem>>, %arg3: memref<1x128xf32, #tpu.memory_space<vmem>>, %arg4: memref<128x128xf32, #tpu.memory_space<vmem>>, %arg5: memref<8x128xf32, #tpu.memory_space<vmem>>, %arg6: memref<8x128xf32, #tpu.memory_space<vmem>>) attributes {dimension_semantics = [#tpu.dimension_semantics<parallel>], iteration_bounds = array<i64: 1>, scalar_prefetch = 0 : i64, scratch_operands = 0 : i64, tpu.core_type = #tpu.core_type<tc>, window_params = [{transform_indices = @transform_0, window_bounds = array<i64: 8, 128>}, {pipeline_mode = #tpu.pipeline_mode<synchronous>, transform_indices = @transform_1, window_bounds = array<i64: 128, 128>}, {pipeline_mode = #tpu.pipeline_mode<synchronous>, transform_indices = @transform_2, window_bounds = array<i64: 1, 128>}, {pipeline_mode = #tpu.pipeline_mode<synchronous>, transform_indices = @transform_3, window_bounds = array<i64: 128, 128>}, {transform_indices = @transform_4, window_bounds = array<i64: 8, 128>}, {transform_indices = @transform_5, window_bounds = array<i64: 8, 128>}]} {
    %c0 = arith.constant 0 : index
    %c0_0 = arith.constant 0 : index
    %0 = vector.load %arg1[%c0, %c0_0] : memref<8x128xf32, #tpu.memory_space<vmem>>, vector<8x128xf32>
    %1 = arith.truncf %0 : vector<8x128xf32> to vector<8x128xbf16>
    %c0_1 = arith.constant 0 : index
    %c0_2 = arith.constant 0 : index
    %2 = vector.load %arg2[%c0_1, %c0_2] : memref<128x128xbf16, #tpu.memory_space<vmem>>, vector<128x128xbf16>
    %cst = arith.constant dense<0.000000e+00> : vector<8x128xf32>
    %3 = tpu.matmul %1, %2, %cst {dimension_numbers = #tpu.dot_dimension_numbers<[1], [0], [0], [1], [0, 0, 1, 1], [], []>} : vector<8x128xbf16>, vector<128x128xbf16>, vector<8x128xf32> -> vector<8x128xf32>
    %c0_3 = arith.constant 0 : index
    %c0_4 = arith.constant 0 : index
    %4 = vector.load %arg3[%c0_3, %c0_4] : memref<1x128xf32, #tpu.memory_space<vmem>>, vector<1x128xf32>
    %5 = vector.broadcast %4 : vector<1x128xf32> to vector<8x128xf32>
    %6 = arith.addf %3, %5 : vector<8x128xf32>
    %7 = math.tanh %6 : vector<8x128xf32>
    %8 = math.exp %7 : vector<8x128xf32>
    %c0_5 = arith.constant 0 : index
    %c0_6 = arith.constant 0 : index
    %9 = vector.load %arg4[%c0_5, %c0_6] : memref<128x128xf32, #tpu.memory_space<vmem>>, vector<128x128xf32>
    %cst_7 = arith.constant dense<0.000000e+00> : vector<8x128xf32>
    %10 = tpu.matmul %8, %9, %cst_7 {dimension_numbers = #tpu.dot_dimension_numbers<[1], [0], [0], [1], [0, 0, 1, 1], [], []>} : vector<8x128xf32>, vector<128x128xf32>, vector<8x128xf32> -> vector<8x128xf32>
    %11 = arith.divf %8, %10 : vector<8x128xf32>
    %12 = math.exp %11 : vector<8x128xf32>
    %c0_8 = arith.constant 0 : index
    %c0_9 = arith.constant 0 : index
    %13 = vector.load %arg6[%c0_8, %c0_9] : memref<8x128xf32, #tpu.memory_space<vmem>>, vector<8x128xf32>
    tpu.vector_store %arg6[%c0_8, %c0_9], %12 {strides = array<i32>} : memref<8x128xf32, #tpu.memory_space<vmem>>, vector<8x128xf32>,
    %14 = arith.mulf %0, %12 : vector<8x128xf32>
    %c0_10 = arith.constant 0 : index
    %c0_11 = arith.constant 0 : index
    %15 = vector.load %arg5[%c0_10, %c0_11] : memref<8x128xf32, #tpu.memory_space<vmem>>, vector<8x128xf32>
    tpu.vector_store %arg5[%c0_10, %c0_11], %14 {strides = array<i32>} : memref<8x128xf32, #tpu.memory_space<vmem>>, vector<8x128xf32>,
    return
  }
  func.func @transform_0(%arg0: i32) -> (i32, i32) {
    %c0_i32 = arith.constant 0 : i32
    %c0_i32_0 = arith.constant 0 : i32
    return %arg0, %c0_i32 : i32, i32
  }
  func.func @transform_1(%arg0: i32) -> (i32, i32) {
    %c0_i32 = arith.constant 0 : i32
    %c0_i32_0 = arith.constant 0 : i32
    %c0_i32_1 = arith.constant 0 : i32
    return %c0_i32, %c0_i32_0 : i32, i32
  }
  func.func @transform_2(%arg0: i32) -> (i32, i32) {
    %c0_i32 = arith.constant 0 : i32
    %c0_i32_0 = arith.constant 0 : i32
    %c0_i32_1 = arith.constant 0 : i32
    return %c0_i32, %c0_i32_0 : i32, i32
  }
  func.func @transform_3(%arg0: i32) -> (i32, i32) {
    %c0_i32 = arith.constant 0 : i32
    %c0_i32_0 = arith.constant 0 : i32
    %c0_i32_1 = arith.constant 0 : i32
    return %c0_i32, %c0_i32_0 : i32, i32
  }
  func.func @transform_4(%arg0: i32) -> (i32, i32) {
    %c0_i32 = arith.constant 0 : i32
    %c0_i32_0 = arith.constant 0 : i32
    return %arg0, %c0_i32 : i32, i32
  }
  func.func @transform_5(%arg0: i32) -> (i32, i32) {
    %c0_i32 = arith.constant 0 : i32
    %c0_i32_0 = arith.constant 0 : i32
    return %arg0, %c0_i32 : i32, i32
  }
}

</mosaic_0001>

<bundles_post_ra>
// kernel: tpu_custom_call.1
= control target key start
LH: loop header
LB: loop body
LE: loop exit
PB: predicated region body
PF: predicated region fallthrough
CT: control target
= control target key end

     0   :  { %11 = vsyncpa [#allocation3], 0  ;;  %s678_s0 = inlined_call_operand.hbm [shape: f32[8,128], index: 0, kind: input, shape index: {}]   ;;  %s679_s1 = inlined_call_operand.hbm [shape: bf16[128,128], index: 1, kind: input, shape index: {}]   ;;  %s680_s2 = inlined_call_operand.vmem [shape: f32[1,128], index: 2, kind: input, shape index: {}]   ;;  %s681_s3 = inlined_call_operand.hbm [shape: f32[128,128], index: 3, kind: input, shape index: {}]   ;;  %s682_s4 = inlined_call_operand.hbm [shape: f32[8,128], index: 4, kind: output, shape index: {0}]   ;;  %s683_s5 = inlined_call_operand.hbm [shape: f32[8,128], index: 5, kind: output, shape index: {1}]  }
   0x1   :  { %12 = vsyncpa [#allocation6], 0 }
   0x2   :  { %13 = vsyncpa [#allocation4], 0 }
   0x3   :  { %14 = vsyncpa [#allocation10], 0  ;;  %s560_s18 = smov [#allocation5]   ;;  %s442_s22 = scalar_lea.hbm %s679_s1, 1024 }
   0x4   :  { %s30_s19 = sshll.u32 %s560_s18, 4  ;;  %p443_p0 = scmp.ne.s32.totalorder %s679_s1, %s442_s22  ;;  %s31_s19 = int_to_ptr.vmem [resolvable:$true] %s30_s19 }
   0x5   :  { %p446_p1 = scmp.lt.u32.totalorder %s442_s22, %s679_s1 }
   0x7   :  { %p448_p2 = pnand %p446_p1, %p443_p0 }
   0x9   :  { %451 = shalt.err (!%p448_p2)
}
   0xa   :  { %s452_s27 = scalar_lea.vmem %s31_s19, 1024  ;;  %p457_p4 = scmp.lt.s32.totalorder %s31_s19, %s31_s19 }
   0xb   :  { %p453_p3 = scmp.ne.s32.totalorder %s31_s19, %s452_s27  ;;  %p458_p5 = scmp.lt.s32.totalorder %s452_s27, %s452_s27 }
   0xd   :  { %p459_p6 = por %p458_p5, %p457_p4 }
   0xf   :  { %p460_p7 = pnand %p459_p6, %p453_p3 }
  0x11   :  { %463 = shalt.err (!%p460_p7)
}
  0x12   :  { %s561_s28 = smov 64   ;;  %s562_s29 = smov 4  }
  0x13   :  { %36 = dma.hbm_to_vmem [thread:$0]  %s679_s1, 1024, %s31_s19, [#allocation6], %s561_s28, %s561_s28, %s562_s29  }
  0x14   :  { %s563_s7 = smov [#allocation2]   ;;  %s564_s9 = smov [#allocation7]  }
  0x15   :  { %s21_s8 = sshll.u32 %s563_s7, 4  ;;  %s44_s10 = sshll.u32 %s564_s9, 4  ;;  %s22_s8 = int_to_ptr.vmem [resolvable:$true] %s21_s8  ;;  %s45_s10 = int_to_ptr.vmem [resolvable:$true] %s44_s10 }
  0x16   :  { %s464_s13 = scalar_lea.hbm %s678_s0, 128 }
  0x17   :  { %p465_p8 = scmp.ne.s32.totalorder %s678_s0, %s464_s13  ;;  %p468_p9 = scmp.lt.u32.totalorder %s464_s13, %s678_s0 }
  0x19   :  { %p470_p10 = pnand %p468_p9, %p465_p8 }
  0x1b   :  { %473 = shalt.err (!%p470_p10)
}
  0x1c   :  { %s474_s1 = scalar_lea.vmem %s22_s8, 128  ;;  %p479_p12 = scmp.lt.s32.totalorder %s22_s8, %s22_s8 }
  0x1d   :  { %p475_p11 = scmp.ne.s32.totalorder %s22_s8, %s474_s1  ;;  %p480_p13 = scmp.lt.s32.totalorder %s474_s1, %s474_s1 }
  0x1f   :  { %p481_p0 = por %p480_p13, %p479_p12 }
  0x21   :  { %p482_p1 = pnand %p481_p0, %p475_p11 }
  0x23   :  { %485 = shalt.err (!%p482_p1)
}
  0x24   :  { %24 = dma.hbm_to_vmem [thread:$0]  %s678_s0, 128, %s22_s8, [#allocation3]  }
  0x25   :  { %s486_s22 = scalar_lea.hbm %s681_s3, 2048 }
  0x26   :  { %p487_p2 = scmp.ne.s32.totalorder %s681_s3, %s486_s22  ;;  %p490_p3 = scmp.lt.u32.totalorder %s486_s22, %s681_s3 }
  0x28   :  { %p492_p4 = pnand %p490_p3, %p487_p2 }
  0x2a   :  { %495 = shalt.err (!%p492_p4)
}
  0x2b   :  { %s496_s27 = scalar_lea.vmem %s45_s10, 2048  ;;  %p501_p6 = scmp.lt.s32.totalorder %s45_s10, %s45_s10 }
  0x2c   :  { %p497_p5 = scmp.ne.s32.totalorder %s45_s10, %s496_s27  ;;  %p502_p7 = scmp.lt.s32.totalorder %s496_s27, %s496_s27 }
  0x2e   :  { %p503_p8 = por %p502_p7, %p501_p6 }
  0x30   :  { %p504_p9 = pnand %p503_p8, %p497_p5 }
  0x32   :  { %507 = shalt.err (!%p504_p9)
}
  0x33   :  { %s565_s0 = smov 128   ;;  %s566_s28 = smov 8  }
  0x34   :  { %50 = dma.hbm_to_vmem [thread:$0]  %s681_s3, 2048, %s45_s10, [#allocation6], %s565_s0, %s565_s0, %s566_s28  }
  0x35   :  { %552 = dma.done.wait [#allocation3], 128  }
  0x36   :  { %553 = vsyncadd [#allocation3], 4294967168 }
  0x37   :  { %554 = dma.done.wait [#allocation6], 3072  }
  0x38   :  { %555 = vsyncadd [#allocation6], 4294964224  ;;  %v567_v0 = vmov 0.0   ;;  %vm568_vm0 = vmmov 0   ;;  %v569_v1 = vmov 0.0|0.0   ;;  %v426_v2 = vld [vmem:[#allocation5] sm:$0xff]  }
  0x39   :  { %335 = vmatprep.subr.bf16.mxu0 %v567_v0  ;;  %351 = vmatprep.mubr.msk.bf16.mxu0 %vm568_vm0, %v567_v0  ;;  %v427_v3 = vld [vmem:[#allocation5 + $0x8] sm:$0xff]   ;;  %v428_v4 = vld [vmem:[#allocation5 + $0x10] sm:$0xff]   ;;  %v177_v5 = vld [vmem:[#allocation7] sm:$0xff]  ;;  %s570_s7 = smov [#allocation9]   ;;  %s571_s8 = smov [#allocation8]  }
  0x3a   :  { %390 = vmatprep.subr.bf16.mxu1 %v569_v1  ;;  %387 = vmatprep.mubr.msk.f32.mxu1 %vm568_vm0, %v567_v0  ;;  %v178_v6 = vld [vmem:[#allocation7 + $0x8] sm:$0xff]  ;;  %v429_v8 = vld [vmem:[#allocation5 + $0x18] sm:$0xff]   ;;  %v430_v9 = vld [vmem:[#allocation5 + $0x20] sm:$0xff]   ;;  %s276_s9 = sshll.u32 %s571_s8, 4  ;;  %s277_s9 = int_to_ptr.vmem [resolvable:$true] %s276_s9 }
  0x3b   :  { %336 = vmatpush3.bf16.msra.mxu0 %v426_v2  ;;  %v391_v7 = vpack.c.bf16 %v178_v6, %v177_v5  ;;  %v431_v10 = vld [vmem:[#allocation5 + $0x28] sm:$0xff]   ;;  %v432_v11 = vld [vmem:[#allocation5 + $0x30] sm:$0xff]   ;;  %v433_v12 = vld [vmem:[#allocation5 + $0x38] sm:$0xff]  }
  0x3c   :  { %337 = vmatprep.subr.bf16.mxu0 %v567_v0  ;;  %v640_v13 = vld [vmem:[#allocation2] sm:$0xff]  ;;  %v179_v15 = vld [vmem:[#allocation7 + $0x10] sm:$0xff]  ;;  %v181_v18 = vld [vmem:[#allocation7 + $0x20] sm:$0xff] }
  0x3d   :  { %392 = vmatpush3.bf16.msra.mxu1 %v391_v7  ;;  %v62_v14 = vpack.c.bf16 %v640_v13, %v640_v13  ;;  %v180_v16 = vld [vmem:[#allocation7 + $0x18] sm:$0xff]  ;;  %v182_v19 = vld [vmem:[#allocation7 + $0x28] sm:$0xff]  ;;  %v183_v21 = vld [vmem:[#allocation7 + $0x30] sm:$0xff] }
  0x3e   :  { %393 = vmatprep.subr.bf16.mxu1 %v569_v1  ;;  %v394_v17 = vpack.c.bf16 %v180_v16, %v179_v15  ;;  %v397_v20 = vpack.c.bf16 %v182_v19, %v181_v18  ;;  %v184_v22 = vld [vmem:[#allocation7 + $0x38] sm:$0xff]  ;;  %v185_v24 = vld [vmem:[#allocation7 + $0x40] sm:$0xff]  ;;  %v186_v25 = vld [vmem:[#allocation7 + $0x48] sm:$0xff] }
  0x3f   :  { %338 = vmatpush3.bf16.msra.mxu0 %v427_v3  ;;  %v400_v23 = vpack.c.bf16 %v184_v22, %v183_v21  ;;  %v403_v26 = vpack.c.bf16 %v186_v25, %v185_v24  ;;  %v187_v27 = vld [vmem:[#allocation7 + $0x50] sm:$0xff]  ;;  %v188_v28 = vld [vmem:[#allocation7 + $0x58] sm:$0xff]  ;;  %v189_v30 = vld [vmem:[#allocation7 + $0x60] sm:$0xff] }
  0x40   :  { %339 = vmatprep.subr.bf16.mxu0 %v567_v0  ;;  %v406_v29 = vpack.c.bf16 %v188_v28, %v187_v27  ;;  %v190_v31 = vld [vmem:[#allocation7 + $0x68] sm:$0xff]  ;;  %v191_v33 = vld [vmem:[#allocation7 + $0x70] sm:$0xff]  ;;  %v192_v34 = vld [vmem:[#allocation7 + $0x78] sm:$0xff] }
  0x41   :  { %395 = vmatpush3.bf16.msra.mxu1 %v394_v17  ;;  %v409_v32 = vpack.c.bf16 %v190_v31, %v189_v30  ;;  %v412_v35 = vpack.c.bf16 %v192_v34, %v191_v33  ;;  %v300_v36 = vld [vmem:[%s680_s2] ss:$0 sm:$0xff]  ;;  %s286_s2 = sshll.u32 %s570_s7, 4  ;;  %s287_s2 = int_to_ptr.vmem [resolvable:$true] %s286_s2 }
  0x42   :  { %396 = vmatprep.subr.bf16.mxu1 %v569_v1  ;;  %s508_s10 = scalar_lea.vmem %s287_s2, 128  ;;  %p513_p11 = scmp.lt.s32.totalorder %s287_s2, %s287_s2 }
  0x43   :  { %340 = vmatpush3.bf16.msra.mxu0 %v428_v4  ;;  %p509_p10 = scmp.ne.s32.totalorder %s287_s2, %s508_s10  ;;  %p514_p12 = scmp.lt.s32.totalorder %s508_s10, %s508_s10 }
  0x44   :  { %341 = vmatprep.subr.bf16.mxu0 %v567_v0 }
  0x45   :  { %398 = vmatpush3.bf16.msra.mxu1 %v397_v20  ;;  %p515_p13 = por %p514_p12, %p513_p11 }
  0x46   :  { %399 = vmatprep.subr.bf16.mxu1 %v569_v1 }
  0x47   :  { %342 = vmatpush3.bf16.msra.mxu0 %v429_v8  ;;  %p516_p0 = pnand %p515_p13, %p509_p10 }
  0x48   :  { %343 = vmatprep.subr.bf16.mxu0 %v567_v0 }
  0x49   :  { %401 = vmatpush3.bf16.msra.mxu1 %v400_v23 }
  0x4a   :  { %402 = vmatprep.subr.bf16.mxu1 %v569_v1 }
  0x4b   :  { %344 = vmatpush3.bf16.msra.mxu0 %v430_v9 }
  0x4c   :  { %345 = vmatprep.subr.bf16.mxu0 %v567_v0 }
  0x4d   :  { %404 = vmatpush3.bf16.msra.mxu1 %v403_v26 }
  0x4e   :  { %405 = vmatprep.subr.bf16.mxu1 %v569_v1 }
  0x4f   :  { %346 = vmatpush3.bf16.msra.mxu0 %v431_v10 }
  0x50   :  { %347 = vmatprep.subr.bf16.mxu0 %v567_v0 }
  0x51   :  { %407 = vmatpush3.bf16.msra.mxu1 %v406_v29 }
  0x52   :  { %408 = vmatprep.subr.bf16.mxu1 %v569_v1 }
  0x53   :  { %348 = vmatpush3.bf16.msra.mxu0 %v432_v11 }
  0x54   :  { %349 = vmatprep.subr.bf16.mxu0 %v567_v0 }
  0x55   :  { %410 = vmatpush3.bf16.msra.mxu1 %v409_v32 }
  0x56   :  { %411 = vmatprep.subr.bf16.mxu1 %v569_v1 }
  0x57   :  { %350 = vmatpush3.bf16.msra.mxu0 %v433_v12 }
  0x59   :  { %413 = vmatpush3.bf16.msra.mxu1 %v412_v35 }
  0x5a   :  { %352 = vmatmul.mubr.bf16.vlgmr.msra.gmra.mrb[0].mxu0 %v62_v14 }
 0x12d   :  { %v168_v37 = vpop.f32.mrb[0].mxu0 }
 0x12e   :  { %v169_v38 = vadd.f32 %v300_v36, %v168_v37  ;;  %v353_v39 = vpop.f32.mrb[1].mxu0 }
 0x12f   :  { %v171_v40 = vpop.f32.mrb[2].mxu0 }
 0x130   :  { %434 = vtanh.f32 %v169_v38  ;;  %v354_v41 = vpop.f32.mrb[3].mxu0 }
 0x13a   :  { %v435_v42 = vpop.eup %434 }
 0x13b   :  { %v175_v43 = vmul.f32 1.442695, %v435_v42 }
 0x13d   :  { %436 = vpow2.f32 %v175_v43 }
 0x147   :  { %v437_v44 = vpop.eup %436 }
 0x148   :  { %388 = vmatmul.mubr.f32.vlgmr.msra.gmra.mrb[0].mxu1 %v437_v44 }
 0x21b   :  { %v259_v45 = vpop.f32.mrb[0].mxu1 }
 0x21c   :  { %438 = vrcp.f32 %v259_v45  ;;  %v389_v46 = vpop.f32.mrb[1].mxu1 }
 0x226   :  { %v439_v47 = vpop.eup %438 }
 0x227   :  { %v264_v48 = vmul.f32 %v439_v47, %v437_v44 }
 0x229   :  { %v265_v49 = vmul.f32 1.442695, %v264_v48 }
 0x22b   :  { %440 = vpow2.f32 %v265_v49 }
 0x235   :  { %v441_v50 = vpop.eup %440 }
 0x236   :  { %267 = vst [vmem:[#allocation9] sm:$0xff] %v441_v50  ;;  %v268_v51 = vmul.f32 %v441_v50, %v640_v13 }
 0x237   :  { %519 = shalt.err (!%p516_p0)
}
 0x238   :  { %s520_s13 = scalar_lea.hbm %s683_s5, 128 }
 0x239   :  { %p521_p1 = scmp.ne.s32.totalorder %s683_s5, %s520_s13  ;;  %p524_p2 = scmp.lt.u32.totalorder %s520_s13, %s683_s5 }
 0x23b   :  { %p526_p3 = pnand %p524_p2, %p521_p1 }
 0x23d   :  { %529 = shalt.err (!%p526_p3)
}
 0x23e   :  { %289 = dma.vmem_to_hbm [thread:$0]  %s287_s2, 128, %s683_s5, [#allocation10]   ;;  %269 = vst [vmem:[#allocation8] sm:$0xff] %v268_v51 }
 0x23f   :  { %s530_s19 = scalar_lea.vmem %s277_s9, 128  ;;  %p535_p5 = scmp.lt.s32.totalorder %s277_s9, %s277_s9 }
 0x240   :  { %p531_p4 = scmp.ne.s32.totalorder %s277_s9, %s530_s19  ;;  %p536_p6 = scmp.lt.s32.totalorder %s530_s19, %s530_s19 }
 0x242   :  { %p537_p7 = por %p536_p6, %p535_p5 }
 0x244   :  { %p538_p8 = pnand %p537_p7, %p531_p4 }
 0x246   :  { %541 = shalt.err (!%p538_p8)
}
 0x247   :  { %s542_s22 = scalar_lea.hbm %s682_s4, 128 }
 0x248   :  { %p543_p9 = scmp.ne.s32.totalorder %s682_s4, %s542_s22  ;;  %p546_p10 = scmp.lt.u32.totalorder %s542_s22, %s682_s4 }
 0x24a   :  { %p548_p11 = pnand %p546_p10, %p543_p9 }
 0x24c   :  { %551 = shalt.err (!%p548_p11)
}
 0x24d   :  { %279 = dma.vmem_to_hbm [thread:$0]  %s277_s9, 128, %s682_s4, [#allocation4]  }
 0x24e   :  { %556 = dma.done.wait [#allocation4], 128  }
 0x24f   :  { %557 = vsyncadd [#allocation4], 4294967168 }
 0x250   :  { %558 = dma.done.wait [#allocation10], 128  }
 0x251   :  { %559 = vsyncadd [#allocation10], 4294967168 }
 0x252   :  { %296 = vsyncpa [#allocation3], 1 }
 0x253   :  { %297 = vsyncpa [#allocation6], 1 }
 0x254   :  { %298 = vsyncpa [#allocation4], 1 }
 0x255   :  { %299 = vsyncpa [#allocation10], 1 }

// kernel: tpu_custom_call.1
= control target key start
LH: loop header
LB: loop body
LE: loop exit
PB: predicated region body
PF: predicated region fallthrough
CT: control target
= control target key end

     0   :  { %11 = vsyncpa [#allocation3], 0  ;;  %s678_s0 = inlined_call_operand.hbm [shape: f32[8,128], index: 0, kind: input, shape index: {}]   ;;  %s679_s1 = inlined_call_operand.hbm [shape: bf16[128,128], index: 1, kind: input, shape index: {}]   ;;  %s680_s2 = inlined_call_operand.vmem [shape: f32[1,128], index: 2, kind: input, shape index: {}]   ;;  %s681_s3 = inlined_call_operand.hbm [shape: f32[128,128], index: 3, kind: input, shape index: {}]   ;;  %s682_s4 = inlined_call_operand.hbm [shape: f32[8,128], index: 4, kind: output, shape index: {0}]   ;;  %s683_s5 = inlined_call_operand.hbm [shape: f32[8,128], index: 5, kind: output, shape index: {1}]  }
   0x1   :  { %12 = vsyncpa [#allocation6], 0 }
   0x2   :  { %13 = vsyncpa [#allocation4], 0 }
   0x3   :  { %14 = vsyncpa [#allocation10], 0  ;;  %s560_s18 = smov [#allocation5]   ;;  %s442_s22 = scalar_lea.hbm %s679_s1, 1024 }
   0x4   :  { %s30_s19 = sshll.u32 %s560_s18, 4  ;;  %p443_p0 = scmp.ne.s32.totalorder %s679_s1, %s442_s22  ;;  %s31_s19 = int_to_ptr.vmem [resolvable:$true] %s30_s19 }
   0x5   :  { %p446_p1 = scmp.lt.u32.totalorder %s442_s22, %s679_s1 }
   0x7   :  { %p448_p2 = pnand %p446_p1, %p443_p0 }
   0x9   :  { %451 = shalt.err (!%p448_p2)
}
   0xa   :  { %s452_s27 = scalar_lea.vmem %s31_s19, 1024  ;;  %p457_p4 = scmp.lt.s32.totalorder %s31_s19, %s31_s19 }
   0xb   :  { %p453_p3 = scmp.ne.s32.totalorder %s31_s19, %s452_s27  ;;  %p458_p5 = scmp.lt.s32.totalorder %s452_s27, %s452_s27 }
   0xd   :  { %p459_p6 = por %p458_p5, %p457_p4 }
   0xf   :  { %p460_p7 = pnand %p459_p6, %p453_p3 }
  0x11   :  { %463 = shalt.err (!%p460_p7)
}
  0x12   :  { %s561_s28 = smov 64   ;;  %s562_s29 = smov 4  }
  0x13   :  { %36 = dma.hbm_to_vmem [thread:$0]  %s679_s1, 1024, %s31_s19, [#allocation6], %s561_s28, %s561_s28, %s562_s29  }
  0x14   :  { %s563_s7 = smov [#allocation2]   ;;  %s564_s9 = smov [#allocation7]  }
  0x15   :  { %s21_s8 = sshll.u32 %s563_s7, 4  ;;  %s44_s10 = sshll.u32 %s564_s9, 4  ;;  %s22_s8 = int_to_ptr.vmem [resolvable:$true] %s21_s8  ;;  %s45_s10 = int_to_ptr.vmem [resolvable:$true] %s44_s10 }
  0x16   :  { %s464_s13 = scalar_lea.hbm %s678_s0, 128 }
  0x17   :  { %p465_p8 = scmp.ne.s32.totalorder %s678_s0, %s464_s13  ;;  %p468_p9 = scmp.lt.u32.totalorder %s464_s13, %s678_s0 }
  0x19   :  { %p470_p10 = pnand %p468_p9, %p465_p8 }
  0x1b   :  { %473 = shalt.err (!%p470_p10)
}
  0x1c   :  { %s474_s1 = scalar_lea.vmem %s22_s8, 128  ;;  %p479_p12 = scmp.lt.s32.totalorder %s22_s8, %s22_s8 }
  0x1d   :  { %p475_p11 = scmp.ne.s32.totalorder %s22_s8, %s474_s1  ;;  %p480_p13 = scmp.lt.s32.totalorder %s474_s1, %s474_s1 }
  0x1f   :  { %p481_p0 = por %p480_p13, %p479_p12 }
  0x21   :  { %p482_p1 = pnand %p481_p0, %p475_p11 }
  0x23   :  { %485 = shalt.err (!%p482_p1)
}
  0x24   :  { %24 = dma.hbm_to_vmem [thread:$0]  %s678_s0, 128, %s22_s8, [#allocation3]  }
  0x25   :  { %s486_s22 = scalar_lea.hbm %s681_s3, 2048 }
  0x26   :  { %p487_p2 = scmp.ne.s32.totalorder %s681_s3, %s486_s22  ;;  %p490_p3 = scmp.lt.u32.totalorder %s486_s22, %s681_s3 }
  0x28   :  { %p492_p4 = pnand %p490_p3, %p487_p2 }
  0x2a   :  { %495 = shalt.err (!%p492_p4)
}
  0x2b   :  { %s496_s27 = scalar_lea.vmem %s45_s10, 2048  ;;  %p501_p6 = scmp.lt.s32.totalorder %s45_s10, %s45_s10 }
  0x2c   :  { %p497_p5 = scmp.ne.s32.totalorder %s45_s10, %s496_s27  ;;  %p502_p7 = scmp.lt.s32.totalorder %s496_s27, %s496_s27 }
  0x2e   :  { %p503_p8 = por %p502_p7, %p501_p6 }
  0x30   :  { %p504_p9 = pnand %p503_p8, %p497_p5 }
  0x32   :  { %507 = shalt.err (!%p504_p9)
}
  0x33   :  { %s565_s0 = smov 128   ;;  %s566_s28 = smov 8  }
  0x34   :  { %50 = dma.hbm_to_vmem [thread:$0]  %s681_s3, 2048, %s45_s10, [#allocation6], %s565_s0, %s565_s0, %s566_s28  }
  0x35   :  { %552 = dma.done.wait [#allocation3], 128  }
  0x36   :  { %553 = vsyncadd [#allocation3], 4294967168 }
  0x37   :  { %554 = dma.done.wait [#allocation6], 3072  }
  0x38   :  { %555 = vsyncadd [#allocation6], 4294964224  ;;  %v567_v0 = vmov 0.0   ;;  %vm568_vm0 = vmmov 0   ;;  %v569_v1 = vmov 0.0|0.0   ;;  %v426_v2 = vld [vmem:[#allocation5] sm:$0xff]  }
  0x39   :  { %335 = vmatprep.subr.bf16.mxu0 %v567_v0  ;;  %351 = vmatprep.mubr.msk.bf16.mxu0 %vm568_vm0, %v567_v0  ;;  %v427_v3 = vld [vmem:[#allocation5 + $0x8] sm:$0xff]   ;;  %v428_v4 = vld [vmem:[#allocation5 + $0x10] sm:$0xff]   ;;  %v177_v5 = vld [vmem:[#allocation7] sm:$0xff]  ;;  %s570_s7 = smov [#allocation9]   ;;  %s571_s8 = smov [#allocation8]  }
  0x3a   :  { %390 = vmatprep.subr.bf16.mxu1 %v569_v1  ;;  %387 = vmatprep.mubr.msk.f32.mxu1 %vm568_vm0, %v567_v0  ;;  %v178_v6 = vld [vmem:[#allocation7 + $0x8] sm:$0xff]  ;;  %v429_v8 = vld [vmem:[#allocation5 + $0x18] sm:$0xff]   ;;  %v430_v9 = vld [vmem:[#allocation5 + $0x20] sm:$0xff]   ;;  %s276_s9 = sshll.u32 %s571_s8, 4  ;;  %s277_s9 = int_to_ptr.vmem [resolvable:$true] %s276_s9 }
  0x3b   :  { %336 = vmatpush3.bf16.msra.mxu0 %v426_v2  ;;  %v391_v7 = vpack.c.bf16 %v178_v6, %v177_v5  ;;  %v431_v10 = vld [vmem:[#allocation5 + $0x28] sm:$0xff]   ;;  %v432_v11 = vld [vmem:[#allocation5 + $0x30] sm:$0xff]   ;;  %v433_v12 = vld [vmem:[#allocation5 + $0x38] sm:$0xff]  }
  0x3c   :  { %337 = vmatprep.subr.bf16.mxu0 %v567_v0  ;;  %v640_v13 = vld [vmem:[#allocation2] sm:$0xff]  ;;  %v179_v15 = vld [vmem:[#allocation7 + $0x10] sm:$0xff]  ;;  %v181_v18 = vld [vmem:[#allocation7 + $0x20] sm:$0xff] }
  0x3d   :  { %392 = vmatpush3.bf16.msra.mxu1 %v391_v7  ;;  %v62_v14 = vpack.c.bf16 %v640_v13, %v640_v13  ;;  %v180_v16 = vld [vmem:[#allocation7 + $0x18] sm:$0xff]  ;;  %v182_v19 = vld [vmem:[#allocation7 + $0x28] sm:$0xff]  ;;  %v183_v21 = vld [vmem:[#allocation7 + $0x30] sm:$0xff] }
  0x3e   :  { %393 = vmatprep.subr.bf16.mxu1 %v569_v1  ;;  %v394_v17 = vpack.c.bf16 %v180_v16, %v179_v15  ;;  %v397_v20 = vpack.c.bf16 %v182_v19, %v181_v18  ;;  %v184_v22 = vld [vmem:[#allocation7 + $0x38] sm:$0xff]  ;;  %v185_v24 = vld [vmem:[#allocation7 + $0x40] sm:$0xff]  ;;  %v186_v25 = vld [vmem:[#allocation7 + $0x48] sm:$0xff] }
  0x3f   :  { %338 = vmatpush3.bf16.msra.mxu0 %v427_v3  ;;  %v400_v23 = vpack.c.bf16 %v184_v22, %v183_v21  ;;  %v403_v26 = vpack.c.bf16 %v186_v25, %v185_v24  ;;  %v187_v27 = vld [vmem:[#allocation7 + $0x50] sm:$0xff]  ;;  %v188_v28 = vld [vmem:[#allocation7 + $0x58] sm:$0xff]  ;;  %v189_v30 = vld [vmem:[#allocation7 + $0x60] sm:$0xff] }
  0x40   :  { %339 = vmatprep.subr.bf16.mxu0 %v567_v0  ;;  %v406_v29 = vpack.c.bf16 %v188_v28, %v187_v27  ;;  %v190_v31 = vld [vmem:[#allocation7 + $0x68] sm:$0xff]  ;;  %v191_v33 = vld [vmem:[#allocation7 + $0x70] sm:$0xff]  ;;  %v192_v34 = vld [vmem:[#allocation7 + $0x78] sm:$0xff] }
  0x41   :  { %395 = vmatpush3.bf16.msra.mxu1 %v394_v17  ;;  %v409_v32 = vpack.c.bf16 %v190_v31, %v189_v30  ;;  %v412_v35 = vpack.c.bf16 %v192_v34, %v191_v33  ;;  %v300_v36 = vld [vmem:[%s680_s2] ss:$0 sm:$0xff]  ;;  %s286_s2 = sshll.u32 %s570_s7, 4  ;;  %s287_s2 = int_to_ptr.vmem [resolvable:$true] %s286_s2 }
  0x42   :  { %396 = vmatprep.subr.bf16.mxu1 %v569_v1  ;;  %s508_s10 = scalar_lea.vmem %s287_s2, 128  ;;  %p513_p11 = scmp.lt.s32.totalorder %s287_s2, %s287_s2 }
  0x43   :  { %340 = vmatpush3.bf16.msra.mxu0 %v428_v4  ;;  %p509_p10 = scmp.ne.s32.totalorder %s287_s2, %s508_s10  ;;  %p514_p12 = scmp.lt.s32.totalorder %s508_s10, %s508_s10 }
  0x44   :  { %341 = vmatprep.subr.bf16.mxu0 %v567_v0 }
  0x45   :  { %398 = vmatpush3.bf16.msra.mxu1 %v397_v20  ;;  %p515_p13 = por %p514_p12, %p513_p11 }
  0x46   :  { %399 = vmatprep.subr.bf16.mxu1 %v569_v1 }
  0x47   :  { %342 = vmatpush3.bf16.msra.mxu0 %v429_v8  ;;  %p516_p0 = pnand %p515_p13, %p509_p10 }
  0x48   :  { %343 = vmatprep.subr.bf16.mxu0 %v567_v0 }
  0x49   :  { %401 = vmatpush3.bf16.msra.mxu1 %v400_v23 }
  0x4a   :  { %402 = vmatprep.subr.bf16.mxu1 %v569_v1 }
  0x4b   :  { %344 = vmatpush3.bf16.msra.mxu0 %v430_v9 }
  0x4c   :  { %345 = vmatprep.subr.bf16.mxu0 %v567_v0 }
  0x4d   :  { %404 = vmatpush3.bf16.msra.mxu1 %v403_v26 }
  0x4e   :  { %405 = vmatprep.subr.bf16.mxu1 %v569_v1 }
  0x4f   :  { %346 = vmatpush3.bf16.msra.mxu0 %v431_v10 }
  0x50   :  { %347 = vmatprep.subr.bf16.mxu0 %v567_v0 }
  0x51   :  { %407 = vmatpush3.bf16.msra.mxu1 %v406_v29 }
  0x52   :  { %408 = vmatprep.subr.bf16.mxu1 %v569_v1 }
  0x53   :  { %348 = vmatpush3.bf16.msra.mxu0 %v432_v11 }
  0x54   :  { %349 = vmatprep.subr.bf16.mxu0 %v567_v0 }
  0x55   :  { %410 = vmatpush3.bf16.msra.mxu1 %v409_v32 }
  0x56   :  { %411 = vmatprep.subr.bf16.mxu1 %v569_v1 }
  0x57   :  { %350 = vmatpush3.bf16.msra.mxu0 %v433_v12 }
  0x59   :  { %413 = vmatpush3.bf16.msra.mxu1 %v412_v35 }
  0x5a   :  { %352 = vmatmul.mubr.bf16.vlgmr.msra.gmra.mrb[0].mxu0 %v62_v14 }
 0x12d   :  { %v168_v37 = vpop.f32.mrb[0].mxu0 }
 0x12e   :  { %v169_v38 = vadd.f32 %v300_v36, %v168_v37  ;;  %v353_v39 = vpop.f32.mrb[1].mxu0 }
 0x12f   :  { %v171_v40 = vpop.f32.mrb[2].mxu0 }
 0x130   :  { %434 = vtanh.f32 %v169_v38  ;;  %v354_v41 = vpop.f32.mrb[3].mxu0 }
 0x13a   :  { %v435_v42 = vpop.eup %434 }
 0x13b   :  { %v175_v43 = vmul.f32 1.442695, %v435_v42 }
 0x13d   :  { %436 = vpow2.f32 %v175_v43 }
 0x147   :  { %v437_v44 = vpop.eup %436 }
 0x148   :  { %388 = vmatmul.mubr.f32.vlgmr.msra.gmra.mrb[0].mxu1 %v437_v44 }
 0x21b   :  { %v259_v45 = vpop.f32.mrb[0].mxu1 }
 0x21c   :  { %438 = vrcp.f32 %v259_v45  ;;  %v389_v46 = vpop.f32.mrb[1].mxu1 }
 0x226   :  { %v439_v47 = vpop.eup %438 }
 0x227   :  { %v264_v48 = vmul.f32 %v439_v47, %v437_v44 }
 0x229   :  { %v265_v49 = vmul.f32 1.442695, %v264_v48 }
 0x22b   :  { %440 = vpow2.f32 %v265_v49 }
 0x235   :  { %v441_v50 = vpop.eup %440 }
 0x236   :  { %267 = vst [vmem:[#allocation9] sm:$0xff] %v441_v50  ;;  %v268_v51 = vmul.f32 %v441_v50, %v640_v13 }
 0x237   :  { %519 = shalt.err (!%p516_p0)
}
 0x238   :  { %s520_s13 = scalar_lea.hbm %s683_s5, 128 }
 0x239   :  { %p521_p1 = scmp.ne.s32.totalorder %s683_s5, %s520_s13  ;;  %p524_p2 = scmp.lt.u32.totalorder %s520_s13, %s683_s5 }
 0x23b   :  { %p526_p3 = pnand %p524_p2, %p521_p1 }
 0x23d   :  { %529 = shalt.err (!%p526_p3)
}
 0x23e   :  { %289 = dma.vmem_to_hbm [thread:$0]  %s287_s2, 128, %s683_s5, [#allocation10]   ;;  %269 = vst [vmem:[#allocation8] sm:$0xff] %v268_v51 }
 0x23f   :  { %s530_s19 = scalar_lea.vmem %s277_s9, 128  ;;  %p535_p5 = scmp.lt.s32.totalorder %s277_s9, %s277_s9 }
 0x240   :  { %p531_p4 = scmp.ne.s32.totalorder %s277_s9, %s530_s19  ;;  %p536_p6 = scmp.lt.s32.totalorder %s530_s19, %s530_s19 }
 0x242   :  { %p537_p7 = por %p536_p6, %p535_p5 }
 0x244   :  { %p538_p8 = pnand %p537_p7, %p531_p4 }
 0x246   :  { %541 = shalt.err (!%p538_p8)
}
 0x247   :  { %s542_s22 = scalar_lea.hbm %s682_s4, 128 }
 0x248   :  { %p543_p9 = scmp.ne.s32.totalorder %s682_s4, %s542_s22  ;;  %p546_p10 = scmp.lt.u32.totalorder %s542_s22, %s682_s4 }
 0x24a   :  { %p548_p11 = pnand %p546_p10, %p543_p9 }
 0x24c   :  { %551 = shalt.err (!%p548_p11)
}
 0x24d   :  { %279 = dma.vmem_to_hbm [thread:$0]  %s277_s9, 128, %s682_s4, [#allocation4]  }
 0x24e   :  { %556 = dma.done.wait [#allocation4], 128  }
 0x24f   :  { %557 = vsyncadd [#allocation4], 4294967168 }
 0x250   :  { %558 = dma.done.wait [#allocation10], 128  }
 0x251   :  { %559 = vsyncadd [#allocation10], 4294967168 }
 0x252   :  { %296 = vsyncpa [#allocation3], 1 }
 0x253   :  { %297 = vsyncpa [#allocation6], 1 }
 0x254   :  { %298 = vsyncpa [#allocation4], 1 }
 0x255   :  { %299 = vsyncpa [#allocation10], 1 }

</bundles_post_ra>
